<compile_context>
chip_gen: v7x
topology: tpu7x:2x2x1
jax: 0.10.0
libtpu: 0.0.40
codegen_flags: <defaults>
</compile_context>

<pallas_src>
import functools

import jax
import jax.numpy as jnp
from jax import lax
from jax.experimental import pallas as pl
from jax.experimental.pallas import tpu as pltpu


def _ce_head_kernel(labels_ref, x_ref, w_ref, b_ref, logits_ref, loss_ref, *,
                    true_b, true_c):
    """Linear head + CrossEntropyLoss (integer targets from SMEM)."""
    # MXU matmul in bf16 with f32 accumulation; bias add in f32.
    logits = jnp.dot(x_ref[...], w_ref[...],
                     preferred_element_type=jnp.float32) + b_ref[...]
    logits_ref[...] = logits                                  # [B_pad, C_pad] f32

    b_pad, c_pad = logits.shape
    class_iota = lax.broadcasted_iota(jnp.int32, (b_pad, c_pad), 1)
    row_iota = lax.broadcasted_iota(jnp.int32, (b_pad, c_pad), 0)
    lane_valid = class_iota < true_c

    # logsumexp over the true classes only (padded lanes -> -inf).
    masked = jnp.where(lane_valid, logits, jnp.float32(-1e30))
    m = jnp.max(masked, axis=-1, keepdims=True)
    expv = jnp.where(lane_valid, jnp.exp(masked - m), 0.0)
    lse = m + jnp.log(jnp.sum(expv, axis=-1, keepdims=True))  # [B_pad, 1]

    # Select logits[row, label[row]] for the true rows via SMEM scalar reads.
    sel = jnp.zeros((b_pad, c_pad), dtype=jnp.bool_)
    for i in range(true_b):                                   # true_b is static
        li = labels_ref[i]                                    # scalar from SMEM
        sel = sel | ((row_iota == i) & (class_iota == li))
    tgt = jnp.sum(jnp.where(sel, logits, 0.0), axis=-1, keepdims=True)

    nll = lse - tgt                                           # [B_pad, 1]
    row_valid = lax.broadcasted_iota(jnp.int32, (b_pad, 1), 0) < true_b
    loss = jnp.sum(jnp.where(row_valid, nll, 0.0)) / jnp.float32(true_b)
    loss_ref[0, 0] = loss                                     # scalar -> SMEM


def _bce_head_kernel(x_ref, w_ref, b_ref, y_ref, logits_ref, loss_ref, *,
                     true_b, true_c):
    """Linear head + BCEWithLogitsLoss (dense multi-hot targets)."""
    logits = jnp.dot(x_ref[...], w_ref[...],
                     preferred_element_type=jnp.float32) + b_ref[...]
    logits_ref[...] = logits

    b_pad, c_pad = logits.shape
    y = y_ref[...]
    # Numerically-stable BCE-with-logits, kept in f32 (EUP exp/log).
    per_elem = (jnp.maximum(logits, 0.0) - logits * y
                + jnp.log(1.0 + jnp.exp(-jnp.abs(logits))))

    class_iota = lax.broadcasted_iota(jnp.int32, (b_pad, c_pad), 1)
    row_iota = lax.broadcasted_iota(jnp.int32, (b_pad, c_pad), 0)
    valid = (class_iota < true_c) & (row_iota < true_b)
    loss = (jnp.sum(jnp.where(valid, per_elem, 0.0))
            / jnp.float32(true_b * true_c))
    loss_ref[0, 0] = loss


def _round_up(x, m):
    return ((x + m - 1) // m) * m


def clap_classifier_forward(embeds, weight_t, bias, y, *, multi_label=False):
    """embeds: [B, 512] audio embeddings; weight_t: [512, C] (PyTorch weight
    transposed); bias: [C]; y: [B] int labels (or [B, C] multi-hot if
    multi_label). Returns (loss, logits[B, C])."""
    B, D = embeds.shape
    C = weight_t.shape[1]

    # Lane-dense class dim and bf16 sublane-dense batch dim.
    C_pad = _round_up(max(C, 128), 128)
    B_pad = _round_up(max(B, 16), 16)

    x_p = jnp.zeros((B_pad, D), jnp.bfloat16).at[:B].set(
        embeds.astype(jnp.bfloat16))
    w_p = jnp.zeros((D, C_pad), jnp.bfloat16).at[:, :C].set(
        weight_t.astype(jnp.bfloat16))
    b_p = jnp.zeros((1, C_pad), jnp.float32).at[0, :C].set(
        bias.astype(jnp.float32))

    out_shape = (jax.ShapeDtypeStruct((B_pad, C_pad), jnp.float32),  # logits
                 jax.ShapeDtypeStruct((1, 1), jnp.float32))          # loss (SMEM)
    loss_spec = pl.BlockSpec(memory_space=pltpu.MemorySpace.SMEM)
    cparams = pltpu.CompilerParams(dimension_semantics=("arbitrary",))

    if multi_label:
        y_p = jnp.zeros((B_pad, C_pad), jnp.float32).at[:B, :C].set(
            y.astype(jnp.float32))
        kernel = functools.partial(_bce_head_kernel, true_b=B, true_c=C)
        logits_p, loss = pl.pallas_call(
            kernel,
            out_shape=out_shape,
            grid=(1,),
            in_specs=[
                pl.BlockSpec((B_pad, D), lambda i: (0, 0)),      # embeds (bf16)
                pl.BlockSpec((D, C_pad), lambda i: (0, 0)),      # weight (bf16)
                pl.BlockSpec((1, C_pad), lambda i: (0, 0)),      # bias (f32)
                pl.BlockSpec((B_pad, C_pad), lambda i: (0, 0)),  # multi-hot y
            ],
            out_specs=(
                pl.BlockSpec((B_pad, C_pad), lambda i: (0, 0)),  # logits
                loss_spec,
            ),
            compiler_params=cparams,
        )(x_p, w_p, b_p, y_p)
    else:
        labels = jnp.zeros((B_pad,), jnp.int32).at[:B].set(y.astype(jnp.int32))
        kernel = functools.partial(_ce_head_kernel, true_b=B, true_c=C)
        logits_p, loss = pl.pallas_call(
            kernel,
            out_shape=out_shape,
            grid_spec=pltpu.PrefetchScalarGridSpec(
                num_scalar_prefetch=1,            # integer labels -> SMEM
                grid=(1,),
                in_specs=[
                    pl.BlockSpec((B_pad, D), lambda i, lbl: (0, 0)),
                    pl.BlockSpec((D, C_pad), lambda i, lbl: (0, 0)),
                    pl.BlockSpec((1, C_pad), lambda i, lbl: (0, 0)),
                ],
                out_specs=(
                    pl.BlockSpec((B_pad, C_pad), lambda i, lbl: (0, 0)),
                    loss_spec,
                ),
            ),
            compiler_params=cparams,
        )(labels, x_p, w_p, b_p)

    return loss[0, 0], logits_p[:B, :C]


if __name__ == "__main__":
    B = 2            # batch
    D = 512          # CLAP projection dim (fixed by nn.Linear(in_features=512))
    C = 10           # num_classes

    key = jax.random.PRNGKey(0)
    k_emb, k_w, k_b, k_y = jax.random.split(key, 4)

    # Synthetic audio embeddings standing in for clap(**inputs).audio_embeds.
    embeds = jax.random.normal(k_emb, (B, D), dtype=jnp.float32)

    # Deterministic nn.Linear(512, C)-style init: U(-1/sqrt(D), 1/sqrt(D)).
    bound = 1.0 / jnp.sqrt(jnp.float32(D))
    weight_t = jax.random.uniform(k_w, (D, C), minval=-bound, maxval=bound,
                                  dtype=jnp.float32)
    bias = jax.random.uniform(k_b, (C,), minval=-bound, maxval=bound,
                              dtype=jnp.float32)

    # f32 reference logits.
    logits_ref = embeds @ weight_t + bias[None, :]

    # ---- CrossEntropyLoss path (multi_label=False) ----
    y = jax.random.randint(k_y, (B,), 0, C, dtype=jnp.int32)
    loss, logits = clap_classifier_forward(embeds, weight_t, bias, y,
                                           multi_label=False)
    jax.block_until_ready((loss, logits))

    lse = jax.nn.logsumexp(logits_ref, axis=-1)
    loss_ref = jnp.mean(lse - jnp.take_along_axis(
        logits_ref, y[:, None], axis=-1)[:, 0])
    assert logits.shape == (B, C)
    # bf16 MXU operands (f32 accumulation) loosen the tolerance vs f32 ref.
    assert jnp.allclose(logits, logits_ref, atol=3e-2, rtol=3e-2)
    assert jnp.allclose(loss, loss_ref, atol=3e-2, rtol=3e-2)

    # ---- BCEWithLogitsLoss path (multi_label=True) ----
    y_mh = (jax.random.uniform(k_y, (B, C)) > 0.5).astype(jnp.float32)
    loss_b, logits_b = clap_classifier_forward(embeds, weight_t, bias, y_mh,
                                               multi_label=True)
    jax.block_until_ready((loss_b, logits_b))

    per = (jnp.maximum(logits_ref, 0.0) - logits_ref * y_mh
           + jnp.log1p(jnp.exp(-jnp.abs(logits_ref))))
    loss_b_ref = jnp.mean(per)
    assert jnp.allclose(logits_b, logits_ref, atol=3e-2, rtol=3e-2)
    assert jnp.allclose(loss_b, loss_b_ref, atol=3e-2, rtol=3e-2)

    print("KERNEL_OK")
</pallas_src>

<mosaic_0001>
module attributes {stable_mosaic.version = 11 : i64} {
  func.func @_ce_head_kernel(%arg0: i32, %arg1: memref<16xi32, #tpu.memory_space<smem>>, %arg2: memref<16x512xbf16, #tpu.memory_space<vmem>>, %arg3: memref<512x128xbf16, #tpu.memory_space<vmem>>, %arg4: memref<1x128xf32, #tpu.memory_space<vmem>>, %arg5: memref<16x128xf32, #tpu.memory_space<vmem>>, %arg6: memref<1x1xf32, #tpu.memory_space<smem>>) attributes {dimension_semantics = [#tpu.dimension_semantics<arbitrary>], iteration_bounds = array<i64: 1>, scalar_prefetch = 1 : i64, scratch_operands = 0 : i64, tpu.core_type = #tpu.core_type<tc>, window_params = [{pipeline_mode = #tpu.pipeline_mode<synchronous>, transform_indices = @transform_0, window_bounds = array<i64: 16, 512>}, {pipeline_mode = #tpu.pipeline_mode<synchronous>, transform_indices = @transform_1, window_bounds = array<i64: 512, 128>}, {pipeline_mode = #tpu.pipeline_mode<synchronous>, transform_indices = @transform_2, window_bounds = array<i64: 1, 128>}, {pipeline_mode = #tpu.pipeline_mode<synchronous>, transform_indices = @transform_3, window_bounds = array<i64: 16, 128>}, {transform_indices = @transform_4, window_bounds = array<i64: 1, 1>}]} {
    %c0 = arith.constant 0 : index
    %c0_0 = arith.constant 0 : index
    %0 = vector.load %arg2[%c0, %c0_0] : memref<16x512xbf16, #tpu.memory_space<vmem>>, vector<16x512xbf16>
    %c0_1 = arith.constant 0 : index
    %c0_2 = arith.constant 0 : index
    %1 = vector.load %arg3[%c0_1, %c0_2] : memref<512x128xbf16, #tpu.memory_space<vmem>>, vector<512x128xbf16>
    %cst = arith.constant dense<0.000000e+00> : vector<16x128xf32>
    %2 = tpu.matmul %0, %1, %cst {dimension_numbers = #tpu.dot_dimension_numbers<[1], [0], [0], [1], [0, 0, 1, 1], [], []>} : vector<16x512xbf16>, vector<512x128xbf16>, vector<16x128xf32> -> vector<16x128xf32>
    %c0_3 = arith.constant 0 : index
    %c0_4 = arith.constant 0 : index
    %3 = vector.load %arg4[%c0_3, %c0_4] : memref<1x128xf32, #tpu.memory_space<vmem>>, vector<1x128xf32>
    %4 = vector.broadcast %3 : vector<1x128xf32> to vector<16x128xf32>
    %5 = arith.addf %2, %4 : vector<16x128xf32>
    %c0_5 = arith.constant 0 : index
    %c0_6 = arith.constant 0 : index
    %6 = vector.load %arg5[%c0_5, %c0_6] : memref<16x128xf32, #tpu.memory_space<vmem>>, vector<16x128xf32>
    tpu.vector_store %arg5[%c0_5, %c0_6], %5 {strides = array<i32>} : memref<16x128xf32, #tpu.memory_space<vmem>>, vector<16x128xf32>,
    %7 = tpu.iota {dimensions = array<i32: 1>} : vector<16x128xi32>
    %8 = tpu.iota {dimensions = array<i32: 0>} : vector<16x128xi32>
    %c10_i32 = arith.constant 10 : i32
    %9 = vector.broadcast %c10_i32 : i32 to vector<16x128xi32>
    %10 = arith.cmpi slt, %7, %9 : vector<16x128xi32>
    %cst_7 = arith.constant -1.000000e+30 : f32
    %11 = vector.broadcast %cst_7 : f32 to vector<16x128xf32>
    %12 = arith.select %10, %5, %11 : vector<16x128xi1>, vector<16x128xf32>
    %cst_8 = arith.constant dense<0xFF800000> : vector<16xf32>
    %13 = vector.multi_reduction <maximumf>, %12, %cst_8 [1] : vector<16x128xf32> to vector<16xf32>
    %14 = vector.shape_cast %13 : vector<16xf32> to vector<16x1xf32>
    %15 = vector.broadcast %14 : vector<16x1xf32> to vector<16x128xf32>
    %16 = arith.subf %12, %15 : vector<16x128xf32>
    %17 = math.exp %16 : vector<16x128xf32>
    %cst_9 = arith.constant 0.000000e+00 : f32
    %18 = vector.broadcast %cst_9 : f32 to vector<16x128xf32>
    %19 = arith.select %10, %17, %18 : vector<16x128xi1>, vector<16x128xf32>
    %cst_10 = arith.constant dense<0.000000e+00> : vector<16xf32>
    %20 = vector.multi_reduction <add>, %19, %cst_10 [1] : vector<16x128xf32> to vector<16xf32>
    %21 = vector.shape_cast %20 : vector<16xf32> to vector<16x1xf32>
    %22 = math.log %21 : vector<16x1xf32>
    %23 = arith.addf %14, %22 : vector<16x1xf32>
    %false = arith.constant false
    %24 = vector.broadcast %false : i1 to vector<16x128xi1>
    %c0_11 = arith.constant 0 : index
    %25 = memref.load %arg1[%c0_11] : memref<16xi32, #tpu.memory_space<smem>>
    %c0_i32 = arith.constant 0 : i32
    %26 = vector.broadcast %c0_i32 : i32 to vector<16x128xi32>
    %27 = arith.cmpi eq, %8, %26 : vector<16x128xi32>
    %28 = vector.broadcast %25 : i32 to vector<16x128xi32>
    %29 = arith.cmpi eq, %7, %28 : vector<16x128xi32>
    %30 = arith.andi %27, %29 : vector<16x128xi1>
    %31 = arith.ori %24, %30 : vector<16x128xi1>
    %c1 = arith.constant 1 : index
    %32 = memref.load %arg1[%c1] : memref<16xi32, #tpu.memory_space<smem>>
    %c1_i32 = arith.constant 1 : i32
    %33 = vector.broadcast %c1_i32 : i32 to vector<16x128xi32>
    %34 = arith.cmpi eq, %8, %33 : vector<16x128xi32>
    %35 = vector.broadcast %32 : i32 to vector<16x128xi32>
    %36 = arith.cmpi eq, %7, %35 : vector<16x128xi32>
    %37 = arith.andi %34, %36 : vector<16x128xi1>
    %38 = arith.ori %31, %37 : vector<16x128xi1>
    %cst_12 = arith.constant 0.000000e+00 : f32
    %39 = vector.broadcast %cst_12 : f32 to vector<16x128xf32>
    %40 = arith.select %38, %5, %39 : vector<16x128xi1>, vector<16x128xf32>
    %cst_13 = arith.constant dense<0.000000e+00> : vector<16xf32>
    %41 = vector.multi_reduction <add>, %40, %cst_13 [1] : vector<16x128xf32> to vector<16xf32>
    %42 = vector.shape_cast %41 : vector<16xf32> to vector<16x1xf32>
    %43 = arith.subf %23, %42 : vector<16x1xf32>
    %44 = tpu.iota {dimensions = array<i32: 0>} : vector<16x1xi32>
    %c2_i32 = arith.constant 2 : i32
    %45 = vector.broadcast %c2_i32 : i32 to vector<16x1xi32>
    %46 = arith.cmpi slt, %44, %45 : vector<16x1xi32>
    %cst_14 = arith.constant 0.000000e+00 : f32
    %47 = vector.broadcast %cst_14 : f32 to vector<16x1xf32>
    %48 = arith.select %46, %43, %47 : vector<16x1xi1>, vector<16x1xf32>
    %49 = vector.shape_cast %48 : vector<16x1xf32> to vector<1x16x1xf32>
    %cst_15 = arith.constant dense<0.000000e+00> : vector<1xf32>
    %50 = vector.multi_reduction <add>, %49, %cst_15 [1, 2] : vector<1x16x1xf32> to vector<1xf32>
    %51 = vector.shape_cast %50 : vector<1xf32> to vector<1x1x1xf32>
    %52 = vector.extract %51[0, 0, 0] : f32 from vector<1x1x1xf32>
    %cst_16 = arith.constant 2.000000e+00 : f32
    %53 = arith.divf %52, %cst_16 : f32
    %c0_17 = arith.constant 0 : index
    %c0_18 = arith.constant 0 : index
    %54 = memref.load %arg6[%c0_17, %c0_18] : memref<1x1xf32, #tpu.memory_space<smem>>
    memref.store %53, %arg6[%c0_17, %c0_18] : memref<1x1xf32, #tpu.memory_space<smem>>
    return
  }
  func.func @transform_0(%arg0: i32, %arg1: memref<16xi32, #tpu.memory_space<smem>>) -> (i32, i32) {
    %c0_i32 = arith.constant 0 : i32
    %c0_i32_0 = arith.constant 0 : i32
    %c0_i32_1 = arith.constant 0 : i32
    return %c0_i32, %c0_i32_0 : i32, i32
  }
  func.func @transform_1(%arg0: i32, %arg1: memref<16xi32, #tpu.memory_space<smem>>) -> (i32, i32) {
    %c0_i32 = arith.constant 0 : i32
    %c0_i32_0 = arith.constant 0 : i32
    %c0_i32_1 = arith.constant 0 : i32
    return %c0_i32, %c0_i32_0 : i32, i32
  }
  func.func @transform_2(%arg0: i32, %arg1: memref<16xi32, #tpu.memory_space<smem>>) -> (i32, i32) {
    %c0_i32 = arith.constant 0 : i32
    %c0_i32_0 = arith.constant 0 : i32
    %c0_i32_1 = arith.constant 0 : i32
    return %c0_i32, %c0_i32_0 : i32, i32
  }
  func.func @transform_3(%arg0: i32, %arg1: memref<16xi32, #tpu.memory_space<smem>>) -> (i32, i32) {
    %c0_i32 = arith.constant 0 : i32
    %c0_i32_0 = arith.constant 0 : i32
    %c0_i32_1 = arith.constant 0 : i32
    return %c0_i32, %c0_i32_0 : i32, i32
  }
  func.func @transform_4(%arg0: i32, %arg1: memref<16xi32, #tpu.memory_space<smem>>) -> (i32, i32) {
    %c0_i32 = arith.constant 0 : i32
    %c0_i32_0 = arith.constant 0 : i32
    %c0_i32_1 = arith.constant 0 : i32
    return %c0_i32, %c0_i32_0 : i32, i32
  }
}

</mosaic_0001>

<bundles_post_ra>
// kernel: tpu_custom_call.1
= control target key start
LH: loop header
LB: loop body
LE: loop exit
PB: predicated region body
PF: predicated region fallthrough
CT: control target
= control target key end

     0   :  { %s873_s0 = inlined_call_operand.hbm [shape: s32[16], index: 0, kind: input, shape index: {}]   ;;  %s874_s1 = inlined_call_operand.hbm [shape: bf16[16,512], index: 1, kind: input, shape index: {}]   ;;  %s875_s2 = inlined_call_operand.hbm [shape: bf16[512,128], index: 2, kind: input, shape index: {}]   ;;  %s876_s3 = inlined_call_operand.vmem [shape: f32[1,128], index: 3, kind: input, shape index: {}]   ;;  %s877_s4 = inlined_call_operand.hbm [shape: f32[16,128], index: 4, kind: output, shape index: {0}]   ;;  %s878_s5 = inlined_call_operand.hbm [shape: f32[1,1], index: 5, kind: output, shape index: {1}]  }
   0x1   :  { %s667_s20 = scalar_lea.hbm %s873_s0, 16 }
   0x2   :  { %p668_p0 = scmp.ne.s32.totalorder %s873_s0, %s667_s20  ;;  %p671_p1 = scmp.lt.u32.totalorder %s667_s20, %s873_s0 }
   0x4   :  { %p673_p2 = pnand %p671_p1, %p668_p0 }
   0x6   :  { %676 = shalt.err (!%p673_p2)  }
   0x7   :  { %s763_s25 = smov [#allocation3]  }
   0x8   :  { %12 = dma.hbm_to_smem %s873_s0, 16, %s763_s25, [#allocation2] }
   0x9   :  { %753 = dma.done.wait [#allocation2], 16 }
   0xa   :  { %754 = vsyncadd [#allocation2], 4294967280 }
   0xb   :  { %14 = sfence }
   0xc   :  { %15 = vsyncpa [#allocation5], 0 }
   0xd   :  { %16 = vsyncpa [#allocation9], 0 }
   0xe   :  { %17 = vsyncpa [#allocation6], 0 }
   0xf   :  { %18 = vsyncpa [#allocation7], 0  ;;  %s764_s28 = smov [#allocation4]   ;;  %s677_s7 = scalar_lea.hbm %s874_s1, 512 }
  0x10   :  { %s24_s29 = sshll.u32 %s764_s28, 4  ;;  %p678_p3 = scmp.ne.s32.totalorder %s874_s1, %s677_s7  ;;  %s25_s29 = int_to_ptr.vmem [resolvable:$true] %s24_s29 }
  0x11   :  { %p681_p4 = scmp.lt.u32.totalorder %s677_s7, %s874_s1 }
  0x13   :  { %p683_p5 = pnand %p681_p4, %p678_p3 }
  0x15   :  { %686 = shalt.err (!%p683_p5)
}
  0x16   :  { %s687_s11 = scalar_lea.vmem %s25_s29, 512  ;;  %p692_p7 = scmp.lt.s32.totalorder %s25_s29, %s25_s29 }
  0x17   :  { %p688_p6 = scmp.ne.s32.totalorder %s25_s29, %s687_s11  ;;  %p693_p8 = scmp.lt.s32.totalorder %s687_s11, %s687_s11 }
  0x19   :  { %p694_p9 = por %p693_p8, %p692_p7 }
  0x1b   :  { %p695_p10 = pnand %p694_p9, %p688_p6 }
  0x1d   :  { %698 = shalt.err (!%p695_p10)
}
  0x1e   :  { %s765_s12 = smov 256   ;;  %s766_s13 = smov 16  }
  0x1f   :  { %30 = dma.hbm_to_vmem [thread:$0]  %s874_s1, 512, %s25_s29, [#allocation5], %s765_s12, %s765_s12, %s766_s13  }
  0x20   :  { %s767_s16 = smov [#allocation8]   ;;  %s699_s20 = scalar_lea.hbm %s875_s2, 4096 }
  0x21   :  { %s36_s17 = sshll.u32 %s767_s16, 4  ;;  %p700_p11 = scmp.ne.s32.totalorder %s875_s2, %s699_s20  ;;  %s37_s17 = int_to_ptr.vmem [resolvable:$true] %s36_s17 }
  0x22   :  { %p703_p12 = scmp.lt.u32.totalorder %s699_s20, %s875_s2 }
  0x24   :  { %p705_p13 = pnand %p703_p12, %p700_p11 }
  0x26   :  { %708 = shalt.err (!%p705_p13)
}
  0x27   :  { %s709_s25 = scalar_lea.vmem %s37_s17, 4096  ;;  %p714_p1 = scmp.lt.s32.totalorder %s37_s17, %s37_s17 }
  0x28   :  { %p710_p0 = scmp.ne.s32.totalorder %s37_s17, %s709_s25  ;;  %p715_p2 = scmp.lt.s32.totalorder %s709_s25, %s709_s25 }
  0x2a   :  { %p716_p3 = por %p715_p2, %p714_p1 }
  0x2c   :  { %p717_p4 = pnand %p716_p3, %p710_p0 }
  0x2e   :  { %720 = shalt.err (!%p717_p4)
}
  0x2f   :  { %s768_s1 = smov 64   ;;  %s769_s26 = smov 4  }
  0x30   :  { %42 = dma.hbm_to_vmem [thread:$0]  %s875_s2, 4096, %s37_s17, [#allocation9], %s768_s1, %s768_s1, %s769_s26  }
  0x31   :  { %755 = dma.done.wait [#allocation5], 512  }
  0x32   :  { %756 = vsyncadd [#allocation5], 4294966784 }
  0x33   :  { %757 = dma.done.wait [#allocation9], 4096  }
  0x34   :  { %758 = vsyncadd [#allocation9], 4294963200  ;;  %v625_v0 = vld [vmem:[#allocation8 + $0x40] sm:$0xff]   ;;  %v629_v4 = vld [vmem:[#allocation8 + $0x48] sm:$0xff]   ;;  %s453_s2 = sld [smem:[#allocation3]]  ;;  %s567_s29 = sld [smem:[#allocation3 + $0x1]]  ;;  %v423_v36 = vlaneseq }
  0x35   :  { %v626_v1 = vld [vmem:[#allocation8 + $0xc0] sm:$0xff]   ;;  %568 = vmatprep.subr.bf16.mxu0 %v625_v0  ;;  %v630_v5 = vld [vmem:[#allocation8 + $0xc8] sm:$0xff]   ;;  %v633_v8 = vld [vmem:[#allocation8 + $0x50] sm:$0xff]   ;;  %vm481_vm9 = vcmask 7168  }
  0x36   :  { %v627_v2 = vld [vmem:[#allocation8] sm:$0xff]   ;;  %590 = vmatprep.subr.bf16.mxu1 %v626_v1  ;;  %v631_v6 = vld [vmem:[#allocation8 + $0x8] sm:$0xff]   ;;  %v634_v9 = vld [vmem:[#allocation8 + $0xd0] sm:$0xff]   ;;  %v424_v37 = vand.u32 127, %v423_v36  ;;  %v426_v38 = vshrl.u32 %v423_v36, 7 }
  0x37   :  { %v628_v3 = vld [vmem:[#allocation8 + $0x80] sm:$0xff]   ;;  %569 = vmatpush3.bf16.msra.mxu0 %v627_v2  ;;  %v632_v7 = vld [vmem:[#allocation8 + $0x88] sm:$0xff]   ;;  %v635_v10 = vld [vmem:[#allocation8 + $0x10] sm:$0xff]  }
  0x38   :  { %591 = vmatpush3.bf16.msra.mxu1 %v628_v3  ;;  %570 = vmatprep.subr.bf16.mxu0 %v629_v4  ;;  %v636_v11 = vld [vmem:[#allocation8 + $0x90] sm:$0xff]   ;;  %v637_v12 = vld [vmem:[#allocation8 + $0x58] sm:$0xff]   ;;  %v641_v16 = vld [vmem:[#allocation8 + $0x60] sm:$0xff]   ;;  %vm454_vm0 = vcmp.eq.s32.totalorder %v426_v38, 0  ;;  %vm461_vm2 = vcmp.eq.s32.totalorder %v426_v38, 1  ;;  %vm428_vm7 = vcmp.lt.s32.totalorder %v424_v37, 10 }
  0x39   :  { %592 = vmatprep.subr.bf16.mxu1 %v630_v5  ;;  %v638_v13 = vld [vmem:[#allocation8 + $0xd8] sm:$0xff]   ;;  %v642_v17 = vld [vmem:[#allocation8 + $0xe0] sm:$0xff]   ;;  %v645_v20 = vld [vmem:[#allocation8 + $0x68] sm:$0xff]   ;;  %vm477_vm8 = vcmp.lt.s32.totalorder %v426_v38, 2 }
  0x3a   :  { %v639_v14 = vld [vmem:[#allocation8 + $0x18] sm:$0xff]   ;;  %v643_v18 = vld [vmem:[#allocation8 + $0x20] sm:$0xff]   ;;  %v646_v21 = vld [vmem:[#allocation8 + $0xe8] sm:$0xff]   ;;  %v456_v39 = vstv %s453_s2  ;;  %v463_v40 = vstv %s567_s29 }
  0x3b   :  { %571 = vmatpush3.bf16.msra.mxu0 %v631_v6  ;;  %v640_v15 = vld [vmem:[#allocation8 + $0x98] sm:$0xff]   ;;  %v644_v19 = vld [vmem:[#allocation8 + $0xa0] sm:$0xff]   ;;  %v647_v22 = vld [vmem:[#allocation8 + $0x28] sm:$0xff]   ;;  %vm457_vm1 = vcmp.eq.s32.totalorder %v424_v37, %v456_v39  ;;  %vm464_vm3 = vcmp.eq.s32.totalorder %v424_v37, %v463_v40 }
  0x3c   :  { %593 = vmatpush3.bf16.msra.mxu1 %v632_v7  ;;  %572 = vmatprep.subr.bf16.mxu0 %v633_v8  ;;  %v648_v23 = vld [vmem:[#allocation8 + $0xa8] sm:$0xff]   ;;  %v649_v24 = vld [vmem:[#allocation8 + $0x70] sm:$0xff]   ;;  %v653_v28 = vld [vmem:[#allocation8 + $0x78] sm:$0xff]  }
  0x3d   :  { %594 = vmatprep.subr.bf16.mxu1 %v634_v9  ;;  %v650_v25 = vld [vmem:[#allocation8 + $0xf0] sm:$0xff]   ;;  %v654_v29 = vld [vmem:[#allocation8 + $0xf8] sm:$0xff]   ;;  %v530_v43 = vld [vmem:[%s876_s3] ss:$0 sm:$0xff]  ;;  %s770_s3 = smov [#allocation10]  }
  0x3e   :  { %v651_v26 = vld [vmem:[#allocation8 + $0x30] sm:$0xff]   ;;  %v655_v30 = vld [vmem:[#allocation8 + $0x38] sm:$0xff]   ;;  %vm843_vm4 = vmand %vm454_vm0, %vm457_vm1  ;;  %s504_s7 = sshll.u32 %s770_s3, 4  ;;  %s505_s7 = int_to_ptr.vmem [resolvable:$true] %s504_s7 }
  0x3f   :  { %573 = vmatpush3.bf16.msra.mxu0 %v635_v10  ;;  %v652_v27 = vld [vmem:[#allocation8 + $0xb0] sm:$0xff]   ;;  %v656_v31 = vld [vmem:[#allocation8 + $0xb8] sm:$0xff]   ;;  %vm465_vm5 = vmand %vm461_vm2, %vm464_vm3  ;;  %s721_s8 = scalar_lea.vmem %s505_s7, 256  ;;  %p726_p6 = scmp.lt.s32.totalorder %s505_s7, %s505_s7 }
  0x40   :  { %595 = vmatpush3.bf16.msra.mxu1 %v636_v11  ;;  %574 = vmatprep.subr.bf16.mxu0 %v637_v12  ;;  %v657_v32 = vld [vmem:[#allocation4] ss:$16 sps:$4 sm:$0xff]   ;;  %v659_v33 = vld [vmem:[#allocation4 + $0x4] ss:$16 sps:$4 sm:$0xff]   ;;  %v660_v34 = vld [vmem:[#allocation4 + $0x8] ss:$16 sps:$4 sm:$0xff]   ;;  %p722_p5 = scmp.ne.s32.totalorder %s505_s7, %s721_s8  ;;  %p727_p7 = scmp.lt.s32.totalorder %s721_s8, %s721_s8 }
  0x41   :  { %596 = vmatprep.subr.bf16.mxu1 %v638_v13  ;;  %v662_v35 = vld [vmem:[#allocation4 + $0xc] ss:$16 sps:$4 sm:$0xff]   ;;  %371 = vmatprep.mubr.bf16.mxu0 %v659_v33  ;;  %vm467_vm6 = vmor %vm843_vm4, %vm465_vm5 }
  0x42   :  { %412 = vmatprep.mubr.bf16.mxu1 %v662_v35  ;;  %p728_p8 = por %p727_p7, %p726_p6 }
  0x43   :  { %575 = vmatpush3.bf16.msra.mxu0 %v639_v14 }
  0x44   :  { %597 = vmatpush3.bf16.msra.mxu1 %v640_v15  ;;  %576 = vmatprep.subr.bf16.mxu0 %v641_v16  ;;  %p729_p9 = pnand %p728_p8, %p722_p5 }
  0x45   :  { %598 = vmatprep.subr.bf16.mxu1 %v642_v17 }
  0x47   :  { %577 = vmatpush3.bf16.msra.mxu0 %v643_v18 }
  0x48   :  { %599 = vmatpush3.bf16.msra.mxu1 %v644_v19  ;;  %578 = vmatprep.subr.bf16.mxu0 %v645_v20 }
  0x49   :  { %600 = vmatprep.subr.bf16.mxu1 %v646_v21 }
  0x4b   :  { %579 = vmatpush3.bf16.msra.mxu0 %v647_v22 }
  0x4c   :  { %601 = vmatpush3.bf16.msra.mxu1 %v648_v23  ;;  %580 = vmatprep.subr.bf16.mxu0 %v649_v24 }
  0x4d   :  { %602 = vmatprep.subr.bf16.mxu1 %v650_v25 }
  0x4f   :  { %581 = vmatpush3.bf16.msra.mxu0 %v651_v26 }
  0x50   :  { %603 = vmatpush3.bf16.msra.mxu1 %v652_v27  ;;  %582 = vmatprep.subr.bf16.mxu0 %v653_v28 }
  0x51   :  { %604 = vmatprep.subr.bf16.mxu1 %v654_v29 }
  0x53   :  { %583 = vmatpush3.bf16.msra.mxu0 %v655_v30 }
  0x54   :  { %605 = vmatpush3.bf16.msra.mxu1 %v656_v31 }
  0x56   :  { %372 = vmatmul.mubr.bf16.vlgmr.msra.gmra.mrb[0].mxu0 %v657_v32 }
  0x57   :  { %413 = vmatmul.mubr.bf16.vlgmr.msra.gmra.mrb[0].mxu1 %v660_v34 }
 0x129   :  { %v584_v41 = vpop.f32.mrb[0].mxu0 }
 0x12a   :  { %v606_v42 = vpop.f32.mrb[0].mxu1  ;;  %v585_v44 = vpop.f32.mrb[1].mxu0 }
 0x12b   :  { %v586_v46 = vadd.f32 %v585_v44, %v584_v41  ;;  %v607_v47 = vpop.f32.mrb[1].mxu1  ;;  %v587_v48 = vpop.f32.mrb[2].mxu0 }
 0x12c   :  { %v608_v49 = vadd.f32 %v607_v47, %v606_v42  ;;  %v609_v50 = vpop.f32.mrb[2].mxu1  ;;  %v588_v51 = vpop.f32.mrb[3].mxu0 }
 0x12d   :  { %v374_v52 = vadd.f32 %v586_v46, %v530_v43  ;;  %v589_v53 = vadd.f32 %v588_v51, %v587_v48  ;;  %v610_v54 = vpop.f32.mrb[3].mxu1 }
 0x12e   :  { %v611_v55 = vadd.f32 %v610_v54, %v609_v50 }
 0x12f   :  { %v415_v56 = vadd.f32 %v608_v49, %v374_v52  ;;  %v377_v57 = vadd.f32 %v589_v53, %v530_v43 }
 0x131   :  { %421 = vst [vmem:[#allocation10] sm:$0xff] %v415_v56  ;;  %v418_v58 = vadd.f32 %v611_v55, %v377_v57  ;;  %v469_v59 = vsel %vm467_vm6, %v415_v56, 0.0  ;;  %v429_v60 = vsel %vm428_vm7, %v415_v56, -1e+30 }
 0x132   :  { %471 = vadd.xlane.f32.xlu1 %v469_v59  ;;  %431 = vmax.xlane.f32.xlu0 %v429_v60 }
 0x133   :  { %422 = vst [vmem:[#allocation10 + $0x8] sm:$0xff] %v418_v58 }
 0x1bf   :  { %v432_v61 = vpop.xlane.xlu0 %431  ;;  %v472_v6 = vpop.xlane.xlu1 %471 }
 0x1c0   :  { %v435_v62 = vsub.f32 %v429_v60, %v432_v61 }
 0x1c2   :  { %v437_v63 = vmul.f32 1.442695, %v435_v62 }
 0x1c4   :  { %663 = vpow2.f32 %v437_v63 }
 0x1ce   :  { %v664_v0 = vpop.eup %663 }
 0x1cf   :  { %v441_v1 = vsel %vm428_vm7, %v664_v0, 0.0 }
 0x1d0   :  { %443 = vadd.xlane.f32.xlu0 %v441_v1 }
 0x25d   :  { %v444_v2 = vpop.xlane.xlu0 %443 }
 0x25e   :  { %665 = vlog2.f32 %v444_v2 }
 0x268   :  { %v666_v3 = vpop.eup %665 }
 0x269   :  { %v448_v4 = vmul.f32 0.6931472, %v666_v3 }
 0x26b   :  { %v451_v5 = vadd.f32 %v448_v4, %v432_v61 }
 0x26d   :  { %v475_v7 = vsub.f32 %v451_v5, %v472_v6 }
 0x26f   :  { %v479_v8 = vsel %vm477_vm8, %v475_v7, 0.0 }
 0x270   :  { %v482_v9 = vsel %vm481_vm9, %v479_v8, 0.0 }
 0x271   :  { %485 = vadd.xlane.f32.xlu1 %v482_v9 }
 0x272   :  { %732 = shalt.err (!%p729_p9)
}
 0x273   :  { %s733_s0 = scalar_lea.hbm %s877_s4, 256 }
 0x274   :  { %p734_p10 = scmp.ne.s32.totalorder %s877_s4, %s733_s0  ;;  %p737_p11 = scmp.lt.u32.totalorder %s733_s0, %s877_s4 }
 0x276   :  { %p739_p12 = pnand %p737_p11, %p734_p10 }
 0x278   :  { %742 = shalt.err (!%p739_p12)
}
 0x279   :  { %s771_s15 = smov 128   ;;  %s772_s16 = smov 8  }
 0x27a   :  { %510 = dma.vmem_to_hbm [thread:$0]  %s505_s7, 256, %s877_s4, [#allocation6], %s771_s15, %s771_s15, %s772_s16  }
 0x27b   :  { %s743_s23 = scalar_lea.hbm %s878_s5, 16 }
 0x27c   :  { %p744_p13 = scmp.ne.s32.totalorder %s878_s5, %s743_s23  ;;  %p747_p0 = scmp.lt.u32.totalorder %s743_s23, %s878_s5 }
 0x27e   :  { %p749_p1 = pnand %p747_p0, %p744_p13 }
 0x2fe   :  { %v486_v10 = vpop.xlane.xlu1 %485 }
 0x2ff   :  { %v487_v11 = vrot.slane %v486_v10, 4 }
 0x301   :  { %v488_v12 = vadd.f32 %v487_v11, %v486_v10 }
 0x303   :  { %v489_v13 = vrot.slane %v488_v12, 2 }
 0x305   :  { %v490_v14 = vadd.f32 %v489_v13, %v488_v12 }
 0x307   :  { %v491_v15 = vrot.slane %v490_v14, 1 }
 0x309   :  { %v492_v16 = vadd.f32 %v491_v15, %v490_v14 }
 0x30b   :  { %612 = vpush %v492_v16 }
 0x33c   :  { %s613_s19 = spop %612 }
 0x33d   :  { %s496_s20 = smul.f32 0.5, %s613_s19 }
 0x33f   :  { %498 = sst [smem:[#allocation11]] %s496_s20 }
 0x340   :  { %752 = shalt.err (!%p749_p1)
}
 0x341   :  { %s773_s26 = smov [#allocation11]  }
 0x342   :  { %518 = dma.smem_to_hbm %s773_s26, 16, %s878_s5, [#allocation7]  }
 0x343   :  { %759 = dma.done.wait [#allocation6], 256  }
 0x344   :  { %760 = vsyncadd [#allocation6], 4294967040 }
 0x345   :  { %761 = dma.done.wait [#allocation7], 16  }
 0x346   :  { %762 = vsyncadd [#allocation7], 4294967280 }
 0x347   :  { %525 = sfence }
 0x348   :  { %526 = vsyncpa [#allocation5], 1 }
 0x349   :  { %527 = vsyncpa [#allocation9], 1 }
 0x34a   :  { %528 = vsyncpa [#allocation6], 1 }
 0x34b   :  { %529 = vsyncpa [#allocation7], 1 }

</bundles_post_ra>
